<compile_context>
chip_gen: v5e
topology: v5e:2x2
jax: 0.10.0
libtpu: 0.0.40
codegen_flags: <defaults>
</compile_context>

<pallas_src>
import math

import jax
import jax.numpy as jnp
from jax import lax
from jax.experimental import pallas as pl
from jax.experimental.pallas import tpu as pltpu


def _round_up(x, m):
    return ((x + m - 1) // m) * m


def _pick_tm(M, *, tm_target=1024, min_tile=256):
    """Row-tile size: big tiles amortize ~0.35us/step pipeline overhead, but
    keep >=2 tiles when possible so both TensorCores (v7x / megacore) get work.
    16-row granularity matches bf16 sublane packing."""
    if M <= min_tile:
        return max(_round_up(M, 16), 16)
    return min(tm_target, _round_up(pl.cdiv(M, 2), min_tile))


# ----------------------------------------------------------------------------
# Fused Pallas kernel:
#   ids -> one-hot gather from VMEM-resident embedding table -> X @ W_T + b
# ----------------------------------------------------------------------------
def _embed_linear_kernel(ids_ref, tbl_ref, w_ref, b_ref, o_ref):
    ids = ids_ref[...]                                    # (tm, 1) int32
    tm = ids.shape[0]
    vpad = tbl_ref.shape[0]

    # Exact gather as a tiny one-hot matmul: MXU-friendly, no data-dependent
    # addressing, and inherently safe for garbage ids in ragged edge tiles
    # (those output rows are masked on store anyway).
    iota = lax.broadcasted_iota(jnp.int32, (tm, vpad), 1)
    onehot = (iota == ids).astype(jnp.bfloat16)           # (tm, vpad)
    x = jnp.dot(onehot, tbl_ref[...],
                preferred_element_type=jnp.float32).astype(jnp.bfloat16)

    y = jnp.dot(x, w_ref[...], preferred_element_type=jnp.float32) + b_ref[...]
    o_ref[...] = y.astype(o_ref.dtype)


def pallas_embed_linear(ids, table, w_t, bias, *, tm_target=1024,
                        out_dtype=jnp.float32):
    """y = table[ids] @ w_t + bias, fused in one Pallas call.

    ids:   (M,)   int32 token ids
    table: (Vp, K) bf16 embedding table (Vp padded to a multiple of 16/32)
    w_t:   (K, N) bf16 transposed weight
    bias:  (1, N) f32
    returns (M, N) out_dtype
    """
    M = ids.shape[0]
    V, K = table.shape
    K2, N = w_t.shape
    assert K == K2
    assert bias.shape == (1, N)

    tn = 256 if N % 256 == 0 else N
    assert N % tn == 0

    tm = _pick_tm(M, tm_target=tm_target)
    grid = (pl.cdiv(M, tm), N // tn)            # ragged edge handled by Pallas

    ids2d = ids.reshape(M, 1).astype(jnp.int32)

    # Advisory cost estimate (resident operands counted once, not per tile).
    bytes_accessed = (
        M * 4                                   # token ids
        + V * K * table.dtype.itemsize          # embedding table (resident)
        + K * N * w_t.dtype.itemsize            # weight (resident)
        + N * bias.dtype.itemsize               # bias (resident)
        + M * N * jnp.dtype(out_dtype).itemsize # output stream
    )
    cost = pl.CostEstimate(
        flops=2 * M * K * (N + V),
        transcendentals=0,
        bytes_accessed=bytes_accessed,
    )

    return pl.pallas_call(
        _embed_linear_kernel,
        out_shape=jax.ShapeDtypeStruct((M, N), out_dtype),
        grid_spec=pltpu.PrefetchScalarGridSpec(
            num_scalar_prefetch=0,
            grid=grid,
            in_specs=[
                pl.BlockSpec((tm, 1), lambda i, j: (i, 0)),    # token ids
                pl.BlockSpec((V, K), lambda i, j: (0, 0)),     # embed table
                pl.BlockSpec((K, tn), lambda i, j: (0, j)),    # weight
                pl.BlockSpec((1, tn), lambda i, j: (0, j)),    # bias
            ],
            out_specs=pl.BlockSpec((tm, tn), lambda i, j: (i, j)),
        ),
        compiler_params=pltpu.CompilerParams(
            dimension_semantics=("parallel", "parallel"),
        ),
        cost_estimate=cost,
    )(ids2d, table, w_t, bias)


# ----------------------------------------------------------------------------
# ModelExtender forward (JAX wrapper around the fused Pallas kernel)
# ----------------------------------------------------------------------------
class ModelExtenderJax:
    def __init__(self, key, vocab="bert", out_features=256, vocab_size=30):
        assert vocab == "bert", "synthetic stub uses the bert in_features=768"
        self.vocab = vocab
        self.in_features = 768
        self.out_features = out_features
        self.vocab_size = vocab_size

        k_emb, k_w, k_b = jax.random.split(key, 3)

        # TODO(synk): stand-in for the pretrained ProteinBertModel; a synthetic
        # bf16 embedding table plays the role of self.model(x)[0].
        self.embed_table = jax.random.normal(
            k_emb, (vocab_size, self.in_features), dtype=jnp.float32
        ).astype(jnp.bfloat16)
        vpad = _round_up(vocab_size, 32)
        self.embed_table_padded = (
            jnp.zeros((vpad, self.in_features), jnp.bfloat16)
            .at[:vocab_size].set(self.embed_table)
        )

        # nn.Linear(in_features, out_features) default init; weight stored
        # transposed (K, N), bf16 off the hot path; bias stays f32.
        bound = 1.0 / math.sqrt(self.in_features)
        self.w_t = jax.random.uniform(
            k_w, (self.in_features, self.out_features),
            minval=-bound, maxval=bound, dtype=jnp.float32,
        ).astype(jnp.bfloat16)
        self.bias = jax.random.uniform(
            k_b, (1, self.out_features),
            minval=-bound, maxval=bound, dtype=jnp.float32,
        )

    def __call__(self, tokens):
        # tokens: (B, L) int32
        B, L = tokens.shape
        if self.vocab == "bert" and self.out_features == self.in_features:
            # scale_layer is skipped -> return the (stub) LM representation.
            return jnp.take(self.embed_table, tokens, axis=0)
        # Stub-LM representation + scale_layer, fused in one Pallas call
        # (the (B*L, 768) activation never touches HBM).
        y2d = pallas_embed_linear(
            tokens.reshape(B * L), self.embed_table_padded, self.w_t, self.bias
        )
        return y2d.reshape(B, L, self.out_features)


if __name__ == "__main__":
    key = jax.random.PRNGKey(0)
    k_model, k_tok = jax.random.split(key)

    model = ModelExtenderJax(k_model, vocab="bert", out_features=256)

    def reference(tokens):
        B, L = tokens.shape
        x = jnp.take(model.embed_table, tokens, axis=0).astype(jnp.float32)
        y = x.reshape(B * L, 768) @ model.w_t.astype(jnp.float32) + model.bias
        return y.reshape(B, L, 256)

    # Small shape consistent with the module: batch=2, seq=8.
    B, L = 2, 8
    tokens = jax.random.randint(k_tok, (B, L), minval=0, maxval=30, dtype=jnp.int32)
    out = jax.block_until_ready(model(tokens))
    assert out.shape == (B, L, 256)
    assert jnp.allclose(out, reference(tokens), atol=1e-2, rtol=1e-2)

    # Exercise the ragged-edge path (M = B*L not a tile multiple).
    B2, L2 = 3, 70
    tokens2 = jax.random.randint(
        jax.random.PRNGKey(1), (B2, L2), minval=0, maxval=30, dtype=jnp.int32
    )
    out2 = jax.block_until_ready(model(tokens2))
    assert out2.shape == (B2, L2, 256)
    assert jnp.allclose(out2, reference(tokens2), atol=1e-2, rtol=1e-2)

    print("KERNEL_OK")
</pallas_src>

<mosaic_0001>
module attributes {stable_mosaic.version = 11 : i64} {
  func.func @_embed_linear_kernel(%arg0: i32, %arg1: i32, %arg2: memref<16x1xi32, #tpu.memory_space<vmem>>, %arg3: memref<32x768xbf16, #tpu.memory_space<vmem>>, %arg4: memref<768x256xbf16, #tpu.memory_space<vmem>>, %arg5: memref<1x256xf32, #tpu.memory_space<vmem>>, %arg6: memref<16x256xf32, #tpu.memory_space<vmem>>) attributes {dimension_semantics = [#tpu.dimension_semantics<parallel>, #tpu.dimension_semantics<parallel>], iteration_bounds = array<i64: 1, 1>, scalar_prefetch = 0 : i64, scratch_operands = 0 : i64, tpu.core_type = #tpu.core_type<tc>, window_params = [{transform_indices = @transform_0, window_bounds = array<i64: 16, 1>}, {pipeline_mode = #tpu.pipeline_mode<synchronous>, transform_indices = @transform_1, window_bounds = array<i64: 32, 768>}, {transform_indices = @transform_2, window_bounds = array<i64: 768, 256>}, {transform_indices = @transform_3, window_bounds = array<i64: 1, 256>}, {transform_indices = @transform_4, window_bounds = array<i64: 16, 256>}]} {
    %c0 = arith.constant 0 : index
    %c0_0 = arith.constant 0 : index
    %0 = vector.load %arg2[%c0, %c0_0] : memref<16x1xi32, #tpu.memory_space<vmem>>, vector<16x1xi32>
    %1 = tpu.iota {dimensions = array<i32: 1>} : vector<16x32xi32>
    %2 = vector.broadcast %0 : vector<16x1xi32> to vector<16x32xi32>
    %3 = arith.cmpi eq, %1, %2 : vector<16x32xi32>
    %4 = arith.extui %3 : vector<16x32xi1> to vector<16x32xi32>
    %5 = arith.sitofp %4 : vector<16x32xi32> to vector<16x32xf32>
    %6 = arith.truncf %5 : vector<16x32xf32> to vector<16x32xbf16>
    %c0_1 = arith.constant 0 : index
    %c0_2 = arith.constant 0 : index
    %7 = vector.load %arg3[%c0_1, %c0_2] : memref<32x768xbf16, #tpu.memory_space<vmem>>, vector<32x768xbf16>
    %cst = arith.constant dense<0.000000e+00> : vector<16x768xf32>
    %8 = tpu.matmul %6, %7, %cst {dimension_numbers = #tpu.dot_dimension_numbers<[1], [0], [0], [1], [0, 0, 1, 1], [], []>} : vector<16x32xbf16>, vector<32x768xbf16>, vector<16x768xf32> -> vector<16x768xf32>
    %9 = arith.truncf %8 : vector<16x768xf32> to vector<16x768xbf16>
    %c0_3 = arith.constant 0 : index
    %c0_4 = arith.constant 0 : index
    %10 = vector.load %arg4[%c0_3, %c0_4] : memref<768x256xbf16, #tpu.memory_space<vmem>>, vector<768x256xbf16>
    %cst_5 = arith.constant dense<0.000000e+00> : vector<16x256xf32>
    %11 = tpu.matmul %9, %10, %cst_5 {dimension_numbers = #tpu.dot_dimension_numbers<[1], [0], [0], [1], [0, 0, 1, 1], [], []>} : vector<16x768xbf16>, vector<768x256xbf16>, vector<16x256xf32> -> vector<16x256xf32>
    %c0_6 = arith.constant 0 : index
    %c0_7 = arith.constant 0 : index
    %12 = vector.load %arg5[%c0_6, %c0_7] : memref<1x256xf32, #tpu.memory_space<vmem>>, vector<1x256xf32>
    %13 = vector.broadcast %12 : vector<1x256xf32> to vector<16x256xf32>
    %14 = arith.addf %11, %13 : vector<16x256xf32>
    %c0_8 = arith.constant 0 : index
    %c0_9 = arith.constant 0 : index
    %15 = vector.load %arg6[%c0_8, %c0_9] : memref<16x256xf32, #tpu.memory_space<vmem>>, vector<16x256xf32>
    tpu.vector_store %arg6[%c0_8, %c0_9], %14 {strides = array<i32>} : memref<16x256xf32, #tpu.memory_space<vmem>>, vector<16x256xf32>,
    return
  }
  func.func @transform_0(%arg0: i32, %arg1: i32) -> (i32, i32) {
    %c0_i32 = arith.constant 0 : i32
    %c0_i32_0 = arith.constant 0 : i32
    return %arg0, %c0_i32 : i32, i32
  }
  func.func @transform_1(%arg0: i32, %arg1: i32) -> (i32, i32) {
    %c0_i32 = arith.constant 0 : i32
    %c0_i32_0 = arith.constant 0 : i32
    %c0_i32_1 = arith.constant 0 : i32
    return %c0_i32, %c0_i32_0 : i32, i32
  }
  func.func @transform_2(%arg0: i32, %arg1: i32) -> (i32, i32) {
    %c0_i32 = arith.constant 0 : i32
    %c0_i32_0 = arith.constant 0 : i32
    return %c0_i32, %arg1 : i32, i32
  }
  func.func @transform_3(%arg0: i32, %arg1: i32) -> (i32, i32) {
    %c0_i32 = arith.constant 0 : i32
    %c0_i32_0 = arith.constant 0 : i32
    return %c0_i32, %arg1 : i32, i32
  }
  func.func @transform_4(%arg0: i32, %arg1: i32) -> (i32, i32) {
    %c0_i32 = arith.constant 0 : i32
    return %arg0, %arg1 : i32, i32
  }
}

</mosaic_0001>

<bundles_post_ra>
// kernel: tpu_custom_call.1
= control target key start
LH: loop header
LB: loop body
LE: loop exit
PB: predicated region body
PF: predicated region fallthrough
CT: control target
= control target key end

     0   :  { %9 = vsyncpa [#allocation3], 0  ;;  %s1738_s0 = inlined_call_operand.vmem [shape: s32[16,1], index: 0, kind: input, shape index: {}]   ;;  %s1739_s1 = inlined_call_operand.hbm [shape: bf16[32,768], index: 1, kind: input, shape index: {}]   ;;  %s1740_s2 = inlined_call_operand.hbm [shape: bf16[768,256], index: 2, kind: input, shape index: {}]   ;;  %s1741_s3 = inlined_call_operand.vmem [shape: f32[1,256], index: 3, kind: input, shape index: {}]   ;;  %s1742_s4 = inlined_call_operand.hbm [shape: f32[16,256], index: 4, kind: output, shape index: {}]  }
   0x1   :  { %10 = vsyncpa [#allocation6], 0 }
   0x2   :  { %11 = vsyncpa [#allocation4], 0  ;;  %s18_s17 = sshll.u32 %s1739_s1, 4  ;;  %s1646_s18 = smov [#allocation2]   ;;  %s19_s17 = int_to_ptr.hbm [resolvable:$true] %s18_s17 }
   0x3   :  { %s20_s19 = sshll.u32 %s1646_s18, 4  ;;  %s31_s22 = sshll.u32 %s1740_s2, 4  ;;  %s21_s19 = int_to_ptr.vmem [resolvable:$true] %s20_s19  ;;  %s32_s22 = int_to_ptr.hbm [resolvable:$true] %s31_s22 }
   0x4   :  { %s1647_s23 = smov 384   ;;  %s1648_s24 = smov 24  }
   0x5   :  { %26 = dma.hbm_to_vmem [thread:$0]  %s19_s17, 1536, %s21_s19, [#allocation3], %s1647_s23, %s1647_s23, %s1648_s24  }
   0x6   :  { %s1649_s25 = smov [#allocation5]   ;;  %s1650_s27 = smov 128  }
   0x7   :  { %s33_s26 = sshll.u32 %s1649_s25, 4  ;;  %s1651_s28 = smov 8   ;;  %s34_s26 = int_to_ptr.vmem [resolvable:$true] %s33_s26 }
   0x8   :  { %39 = dma.hbm_to_vmem [thread:$0]  %s32_s22, 12288, %s34_s26, [#allocation6], %s1650_s27, %s1650_s27, %s1651_s28  }
   0x9   :  { %1640 = dma.done.wait [#allocation3], 1536  }
   0xa   :  { %1641 = vsyncadd [#allocation3], 4294965760 }
   0xb   :  { %1642 = dma.done.wait [#allocation6], 12288  }
   0xc   :  { %1643 = vsyncadd [#allocation6], 4294955008  ;;  %v1652_v0 = vmov 0   ;;  %v51_v1 = vld [vmem:[%s1738_s0] sm:$0xff]  ;;  %v52_v2 = vld [vmem:[%s1738_s0 + $0x8] sm:$0xff]  ;;  %v53_v46 = vlaneseq  ;;  %vm140_vm2 = vcmask 261120  }
   0xd   :  { %1567 = vset.pattern.permute.xlu0 %v1652_v0  ;;  %v1036_v3 = vld [vmem:[#allocation2 + $0x30] sm:$0xf]  ;;  %v1457_v4 = vld [vmem:[#allocation2 + $0x44] sm:$0xf0]  ;;  %v1454_v5 = vld [vmem:[#allocation2 + $0x34] sm:$0xf] }
   0xe   :  { %56 = vperm.xlu0 %1567, %v51_v1   ;;  %v1037_v6 = vor.u32 %v1457_v4, %v1036_v3  ;;  %v1038_v7 = vld [vmem:[#allocation2 + $0x48] sm:$0xf0]  ;;  %v1044_v8 = vld [vmem:[#allocation2 + $0x38] sm:$0xf]  ;;  %v1458_v9 = vld [vmem:[#allocation2 + $0x4c] sm:$0xf0] }
   0xf   :  { %v1041_v10 = vor.u32 %v1454_v5, %v1038_v7  ;;  %v1045_v11 = vor.u32 %v1458_v9, %v1044_v8  ;;  %v1455_v12 = vld [vmem:[#allocation2 + $0x3c] sm:$0xf]  ;;  %v1046_v13 = vld [vmem:[#allocation2 + $0x50] sm:$0xf0]  ;;  %v1012_v15 = vld [vmem:[#allocation2] sm:$0xf] }
  0x10   :  { %150 = vmatpush.bf16.msra.mxu0 %v1037_v6  ;;  %v1049_v14 = vor.u32 %v1455_v12, %v1046_v13  ;;  %v1451_v16 = vld [vmem:[#allocation2 + $0x14] sm:$0xf0]  ;;  %v1448_v17 = vld [vmem:[#allocation2 + $0x4] sm:$0xf]  ;;  %v1014_v19 = vld [vmem:[#allocation2 + $0x18] sm:$0xf0] }
  0x11   :  { %164 = vmatpush.bf16.msra.mxu1 %v1041_v10  ;;  %178 = vmatpush.bf16.msra.mxu2 %v1045_v11  ;;  %v1013_v18 = vor.u32 %v1451_v16, %v1012_v15  ;;  %v1020_v20 = vld [vmem:[#allocation2 + $0x8] sm:$0xf]  ;;  %v1452_v21 = vld [vmem:[#allocation2 + $0x1c] sm:$0xf0]  ;;  %v1017_v22 = vor.u32 %v1448_v17, %v1014_v19  ;;  %v1449_v24 = vld [vmem:[#allocation2 + $0xc] sm:$0xf] }
  0x12   :  { %192 = vmatpush.bf16.msra.mxu3 %v1049_v14  ;;  %v1021_v23 = vor.u32 %v1452_v21, %v1020_v20  ;;  %v1022_v25 = vld [vmem:[#allocation2 + $0x20] sm:$0xf0]  ;;  %v1052_v27 = vld [vmem:[#allocation2 + $0x40] sm:$0xf]  ;;  %v1459_v28 = vld [vmem:[#allocation2 + $0x54] sm:$0xf0] }
  0x13   :  { %v1025_v26 = vor.u32 %v1449_v24, %v1022_v25  ;;  %v1456_v29 = vld [vmem:[#allocation2 + $0x44] sm:$0xf]  ;;  %v1053_v30 = vor.u32 %v1459_v28, %v1052_v27  ;;  %v1054_v31 = vld [vmem:[#allocation2 + $0x58] sm:$0xf0]  ;;  %v1028_v32 = vld [vmem:[#allocation2 + $0x10] sm:$0xf] }
  0x14   :  { %151 = vmatpush.bf16.msra.mxu0 %v1013_v18  ;;  %v1453_v33 = vld [vmem:[#allocation2 + $0x24] sm:$0xf0]  ;;  %v1057_v34 = vor.u32 %v1456_v29, %v1054_v31  ;;  %v1450_v35 = vld [vmem:[#allocation2 + $0x14] sm:$0xf]  ;;  %v1030_v36 = vld [vmem:[#allocation2 + $0x28] sm:$0xf0] }
  0x15   :  { %165 = vmatpush.bf16.msra.mxu1 %v1017_v22  ;;  %179 = vmatpush.bf16.msra.mxu2 %v1021_v23  ;;  %v1029_v37 = vor.u32 %v1453_v33, %v1028_v32  ;;  %v1033_v38 = vor.u32 %v1450_v35, %v1030_v36  ;;  %v1122_v39 = vld [vmem:[#allocation5 + $0x70] sm:$0xf]  ;;  %v1475_v40 = vld [vmem:[#allocation5 + $0x74] sm:$0xf0]  ;;  %v1114_v44 = vld [vmem:[#allocation5 + $0x60] sm:$0xf] }
  0x16   :  { %59 = vperm.xlu0 %1567, %v52_v2   ;;  %193 = vmatpush.bf16.msra.mxu3 %v1025_v26  ;;  %v1186_v41 = vld [vmem:[#allocation5 + $0xf0] sm:$0xf]  ;;  %v1123_v42 = vor.u32 %v1475_v40, %v1122_v39  ;;  %v1491_v43 = vld [vmem:[#allocation5 + $0xf4] sm:$0xf0]  ;;  %v1473_v45 = vld [vmem:[#allocation5 + $0x64] sm:$0xf0] }
  0x17   :  { %v1187_v47 = vor.u32 %v1491_v43, %v1186_v41  ;;  %v1178_v48 = vld [vmem:[#allocation5 + $0xe0] sm:$0xf]  ;;  %v1489_v49 = vld [vmem:[#allocation5 + $0xe4] sm:$0xf0]  ;;  %v1115_v51 = vor.u32 %v1473_v45, %v1114_v44  ;;  %v1106_v53 = vld [vmem:[#allocation5 + $0x50] sm:$0xf] }
  0x18   :  { %206 = vmatpush.bf16.msrb.mxu0 %v1053_v30  ;;  %v1179_v52 = vor.u32 %v1489_v49, %v1178_v48  ;;  %v1471_v54 = vld [vmem:[#allocation5 + $0x54] sm:$0xf0]  ;;  %v1170_v55 = vld [vmem:[#allocation5 + $0xd0] sm:$0xf]  ;;  %v54_v57 = vand.u32 127, %v53_v46  ;;  %v1653_v8 = vmov 0.0  }
  0x19   :  { %220 = vmatpush.bf16.msrb.mxu1 %v1057_v34  ;;  %816 = vmatpush.bf16.msrb.mxu2 %v1123_v42  ;;  %v1487_v56 = vld [vmem:[#allocation5 + $0xd4] sm:$0xf0]  ;;  %v1107_v58 = vor.u32 %v1471_v54, %v1106_v53  ;;  %v1098_v60 = vld [vmem:[#allocation5 + $0x40] sm:$0xf]  ;;  %v1469_v61 = vld [vmem:[#allocation5 + $0x44] sm:$0xf0] }
  0x1a   :  { %830 = vmatpush.bf16.msrb.mxu3 %v1187_v47  ;;  %v1171_v59 = vor.u32 %v1487_v56, %v1170_v55  ;;  %v1250_v62 = vld [vmem:[#allocation5 + $0x170] sm:$0xf]  ;;  %v1507_v63 = vld [vmem:[#allocation5 + $0x174] sm:$0xf0]  ;;  %v1099_v3 = vor.u32 %v1469_v61, %v1098_v60  ;;  %v1162_v4 = vld [vmem:[#allocation5 + $0xc0] sm:$0xf] }
  0x1b   :  { %v1314_v1 = vld [vmem:[#allocation5 + $0x1f0] sm:$0xf]  ;;  %v1523_v2 = vld [vmem:[#allocation5 + $0x1f4] sm:$0xf0]  ;;  %v1485_v5 = vld [vmem:[#allocation5 + $0xc4] sm:$0xf0]  ;;  %v1251_v12 = vor.u32 %v1507_v63, %v1250_v62 }
  0x1c   :  { %207 = vmatpush.bf16.msrb.mxu0 %v1029_v37  ;;  %v1090_v6 = vld [vmem:[#allocation5 + $0x30] sm:$0xf]  ;;  %v1467_v7 = vld [vmem:[#allocation5 + $0x34] sm:$0xf0]  ;;  %v1315_v13 = vor.u32 %v1523_v2, %v1314_v1  ;;  %v1242_v14 = vld [vmem:[#allocation5 + $0x160] sm:$0xf]  ;;  %v1163_v18 = vor.u32 %v1485_v5, %v1162_v4 }
  0x1d   :  { %221 = vmatpush.bf16.msrb.mxu1 %v1033_v38  ;;  %817 = vmatpush.bf16.msrb.mxu2 %v1115_v51  ;;  %v1505_v15 = vld [vmem:[#allocation5 + $0x164] sm:$0xf0]  ;;  %v1306_v16 = vld [vmem:[#allocation5 + $0x1e0] sm:$0xf]  ;;  %v1091_v19 = vor.u32 %v1467_v7, %v1090_v6  ;;  %v1154_v20 = vld [vmem:[#allocation5 + $0xb0] sm:$0xf] }
  0x1e   :  { %831 = vmatpush.bf16.msrb.mxu3 %v1179_v52  ;;  %v1521_v17 = vld [vmem:[#allocation5 + $0x1e4] sm:$0xf0]  ;;  %v1483_v21 = vld [vmem:[#allocation5 + $0xb4] sm:$0xf0]  ;;  %v1082_v22 = vld [vmem:[#allocation5 + $0x20] sm:$0xf]  ;;  %v1243_v24 = vor.u32 %v1505_v15, %v1242_v14 }
  0x1f   :  { %v1465_v23 = vld [vmem:[#allocation5 + $0x24] sm:$0xf0]  ;;  %v1307_v25 = vor.u32 %v1521_v17, %v1306_v16  ;;  %v1234_v26 = vld [vmem:[#allocation5 + $0x150] sm:$0xf]  ;;  %v1503_v27 = vld [vmem:[#allocation5 + $0x154] sm:$0xf0]  ;;  %v1155_v30 = vor.u32 %v1483_v21, %v1154_v20 }
  0x20   :  { %v1298_v28 = vld [vmem:[#allocation5 + $0x1d0] sm:$0xf]  ;;  %v1519_v29 = vld [vmem:[#allocation5 + $0x1d4] sm:$0xf0]  ;;  %v1083_v31 = vor.u32 %v1465_v23, %v1082_v22  ;;  %v1146_v32 = vld [vmem:[#allocation5 + $0xa0] sm:$0xf]  ;;  %v1235_v36 = vor.u32 %v1503_v27, %v1234_v26 }
  0x21   :  { %818 = vmatpush.bf16.msrb.mxu2 %v1107_v58  ;;  %v1481_v33 = vld [vmem:[#allocation5 + $0xa4] sm:$0xf0]  ;;  %v1074_v34 = vld [vmem:[#allocation5 + $0x10] sm:$0xf]  ;;  %v1463_v35 = vld [vmem:[#allocation5 + $0x14] sm:$0xf0]  ;;  %v1299_v37 = vor.u32 %v1519_v29, %v1298_v28 }
  0x22   :  { %832 = vmatpush.bf16.msrb.mxu3 %v1171_v59  ;;  %v1226_v38 = vld [vmem:[#allocation5 + $0x140] sm:$0xf]  ;;  %v1501_v39 = vld [vmem:[#allocation5 + $0x144] sm:$0xf0]  ;;  %v1147_v42 = vor.u32 %v1481_v33, %v1146_v32  ;;  %v1075_v43 = vor.u32 %v1463_v35, %v1074_v34  ;;  %v1138_v44 = vld [vmem:[#allocation5 + $0x90] sm:$0xf] }
  0x23   :  { %v1290_v40 = vld [vmem:[#allocation5 + $0x1c0] sm:$0xf]  ;;  %v1517_v41 = vld [vmem:[#allocation5 + $0x1c4] sm:$0xf0]  ;;  %v1479_v45 = vld [vmem:[#allocation5 + $0x94] sm:$0xf0]  ;;  %v1227_v48 = vor.u32 %v1501_v39, %v1226_v38 }
  0x24   :  { %v1066_v46 = vld [vmem:[#allocation5] sm:$0xf]  ;;  %v1461_v47 = vld [vmem:[#allocation5 + $0x4] sm:$0xf0]  ;;  %v1291_v49 = vor.u32 %v1517_v41, %v1290_v40  ;;  %v1378_v51 = vld [vmem:[#allocation5 + $0x270] sm:$0xf]  ;;  %v1139_v56 = vor.u32 %v1479_v45, %v1138_v44 }
  0x25   :  { %819 = vmatpush.bf16.msrb.mxu2 %v1099_v3  ;;  %v1539_v52 = vld [vmem:[#allocation5 + $0x274] sm:$0xf0]  ;;  %v1282_v54 = vld [vmem:[#allocation5 + $0x1b0] sm:$0xf]  ;;  %v1130_v58 = vld [vmem:[#allocation5 + $0x80] sm:$0xf] }
  0x26   :  { %833 = vmatpush.bf16.msrb.mxu3 %v1163_v18  ;;  %v1499_v53 = vld [vmem:[#allocation5 + $0x134] sm:$0xf0]  ;;  %v1477_v59 = vld [vmem:[#allocation5 + $0x84] sm:$0xf0]  ;;  %v1379_v60 = vor.u32 %v1539_v52, %v1378_v51  ;;  %v1442_v61 = vld [vmem:[#allocation5 + $0x2f0] sm:$0xf] }
  0x27   :  { %v1515_v55 = vld [vmem:[#allocation5 + $0x1b4] sm:$0xf0]  ;;  %v1210_v1 = vld [vmem:[#allocation5 + $0x120] sm:$0xf]  ;;  %v1537_v3 = vld [vmem:[#allocation5 + $0x264] sm:$0xf0]  ;;  %v1131_v7 = vor.u32 %v1477_v59, %v1130_v58 }
  0x28   :  { %v1555_v62 = vld [vmem:[#allocation5 + $0x2f4] sm:$0xf0]  ;;  %v1370_v2 = vld [vmem:[#allocation5 + $0x260] sm:$0xf]  ;;  %v1497_v4 = vld [vmem:[#allocation5 + $0x124] sm:$0xf0] }
  0x29   :  { %820 = vmatpush.bf16.msrb.mxu2 %v1091_v19  ;;  %v1274_v5 = vld [vmem:[#allocation5 + $0x1a0] sm:$0xf]  ;;  %v1513_v6 = vld [vmem:[#allocation5 + $0x1a4] sm:$0xf0]  ;;  %v1202_v15 = vld [vmem:[#allocation5 + $0x110] sm:$0xf] }
  0x2a   :  { %834 = vmatpush.bf16.msrb.mxu3 %v1155_v30  ;;  %v1275_v14 = vor.u32 %v1513_v6, %v1274_v5  ;;  %v1362_v16 = vld [vmem:[#allocation5 + $0x250] sm:$0xf]  ;;  %v1535_v17 = vld [vmem:[#allocation5 + $0x254] sm:$0xf0]  ;;  %v1493_v27 = vld [vmem:[#allocation5 + $0x104] sm:$0xf0] }
  0x2b   :  { %v1495_v18 = vld [vmem:[#allocation5 + $0x114] sm:$0xf0]  ;;  %v1266_v19 = vld [vmem:[#allocation5 + $0x190] sm:$0xf]  ;;  %v1363_v22 = vor.u32 %v1535_v17, %v1362_v16  ;;  %v1354_v28 = vld [vmem:[#allocation5 + $0x240] sm:$0xf] }
  0x2c   :  { %v1511_v20 = vld [vmem:[#allocation5 + $0x194] sm:$0xf0]  ;;  %v1426_v23 = vld [vmem:[#allocation5 + $0x2d0] sm:$0xf]  ;;  %v1533_v29 = vld [vmem:[#allocation5 + $0x244] sm:$0xf0] }
  0x2d   :  { %821 = vmatpush.bf16.msrb.mxu2 %v1083_v31  ;;  %v1267_v26 = vor.u32 %v1511_v20, %v1266_v19  ;;  %v1258_v30 = vld [vmem:[#allocation5 + $0x180] sm:$0xf]  ;;  %v1509_v31 = vld [vmem:[#allocation5 + $0x184] sm:$0xf0]  ;;  %v1474_v32 = vld [vmem:[#allocation5 + $0x74] sm:$0xf] }
  0x2e   :  { %835 = vmatpush.bf16.msrb.mxu3 %v1147_v42  ;;  %v1124_v33 = vld [vmem:[#allocation5 + $0x78] sm:$0xf0]  ;;  %v1490_v34 = vld [vmem:[#allocation5 + $0xf4] sm:$0xf]  ;;  %v1418_v38 = vld [vmem:[#allocation5 + $0x2c0] sm:$0xf]  ;;  %v1259_v41 = vor.u32 %v1509_v31, %v1258_v30 }
  0x2f   :  { %v1188_v35 = vld [vmem:[#allocation5 + $0xf8] sm:$0xf0]  ;;  %v1549_v39 = vld [vmem:[#allocation5 + $0x2c4] sm:$0xf0]  ;;  %v1346_v42 = vld [vmem:[#allocation5 + $0x230] sm:$0xf]  ;;  %v1127_v44 = vor.u32 %v1474_v32, %v1124_v33 }
  0x30   :  { %v1191_v45 = vor.u32 %v1490_v34, %v1188_v35  ;;  %v1410_v52 = vld [vmem:[#allocation5 + $0x2b0] sm:$0xf]  ;;  %v1486_v58 = vld [vmem:[#allocation5 + $0xd4] sm:$0xf]  ;;  %v1172_v59 = vld [vmem:[#allocation5 + $0xd8] sm:$0xf0] }
  0x31   :  { %822 = vmatpush.bf16.msrb.mxu2 %v1075_v43  ;;  %v1531_v43 = vld [vmem:[#allocation5 + $0x234] sm:$0xf0]  ;;  %v1529_v5 = vld [vmem:[#allocation5 + $0x224] sm:$0xf0]  ;;  %v1394_v20 = vld [vmem:[#allocation5 + $0x290] sm:$0xf] }
  0x32   :  { %836 = vmatpush.bf16.msrb.mxu3 %v1139_v56  ;;  %v1347_v51 = vor.u32 %v1531_v43, %v1346_v42  ;;  %v1470_v56 = vld [vmem:[#allocation5 + $0x54] sm:$0xf]  ;;  %v1527_v19 = vld [vmem:[#allocation5 + $0x214] sm:$0xf0]  ;;  %v1525_v30 = vld [vmem:[#allocation5 + $0x204] sm:$0xf0] }
  0x33   :  { %v1386_v31 = vld [vmem:[#allocation5 + $0x280] sm:$0xf]  ;;  %v1541_v33 = vld [vmem:[#allocation5 + $0x284] sm:$0xf0]  ;;  %v1462_v35 = vld [vmem:[#allocation5 + $0x14] sm:$0xf] }
  0x34   :  { %v1387_v34 = vor.u32 %v1541_v33, %v1386_v31  ;;  %v1068_v42 = vld [vmem:[#allocation5 + $0x8] sm:$0xf0]  ;;  %v1534_v31 = vld [vmem:[#allocation5 + $0x254] sm:$0xf]  ;;  %s994_s9 = sshll.u32 %s1742_s4, 4  ;;  %s1655_s10 = smov 256   ;;  %s995_s9 = int_to_ptr.hbm [resolvable:$true] %s994_s9 }
  0x35   :  { %s1656_s11 = smov 16  }
  0x36   :  { %837 = vmatpush.bf16.msrb.mxu3 %v1131_v7 }
  0x80   :  { %v57_v50 = vpop.permute.xlu0 %56 }
  0x81   :  { %vm61_vm0 = vcmp.eq.s32.totalorder %v54_v57, %v57_v50  ;;  %v1218_v50 = vld [vmem:[#allocation5 + $0x130] sm:$0xf] }
  0x82   :  { %v1008_v9 = vsel %vm61_vm0, 1.0, %v1653_v8  ;;  %v1219_v63 = vor.u32 %v1499_v53, %v1218_v50  ;;  %v1419_v50 = vor.u32 %v1549_v39, %v1418_v38  ;;  %v1547_v53 = vld [vmem:[#allocation5 + $0x2b4] sm:$0xf0]  ;;  %v1140_v38 = vld [vmem:[#allocation5 + $0x98] sm:$0xf0] }
  0x88   :  { %v60_v0 = vpop.permute.xlu0 %59 }
  0x89   :  { %vm62_vm1 = vcmp.eq.s32.totalorder %v54_v57, %v60_v0  ;;  %v1067_v57 = vor.u32 %v1461_v47, %v1066_v46  ;;  %v1283_v0 = vor.u32 %v1515_v55, %v1282_v54  ;;  %v1472_v46 = vld [vmem:[#allocation5 + $0x64] sm:$0xf]  ;;  %v1116_v47 = vld [vmem:[#allocation5 + $0x68] sm:$0xf0] }
  0x8a   :  { %v1009_v10 = vsel %vm62_vm1, 1.0, %v1653_v8  ;;  %v1443_v8 = vor.u32 %v1555_v62, %v1442_v61  ;;  %v1119_v54 = vor.u32 %v1472_v46, %v1116_v47  ;;  %v1175_v62 = vor.u32 %v1486_v58, %v1172_v59  ;;  %v1504_v59 = vld [vmem:[#allocation5 + $0x164] sm:$0xf] }
  0x8b   :  { %v1694_v11 = vpack.c.bf16 %v1009_v10, %v1008_v9  ;;  %823 = vmatpush.bf16.msrb.mxu2 %v1067_v57  ;;  %v1371_v9 = vor.u32 %v1537_v3, %v1370_v2  ;;  %v1434_v10 = vld [vmem:[#allocation5 + $0x2e0] sm:$0xf]  ;;  %v1108_v57 = vld [vmem:[#allocation5 + $0x58] sm:$0xf0]  ;;  %v1164_v3 = vld [vmem:[#allocation5 + $0xc8] sm:$0xf0] }
  0x8c   :  { %v1111_v61 = vor.u32 %v1470_v56, %v1108_v57 }
  0x8d   :  { %1058 = vmatmul.msk.bf16.vlgmr.msra.gmra.mxu0 %vm140_vm2, %v1694_v11  ;;  %1059 = vmatmul.msk.bf16.vlgmr.msra.gmra.mxu1 %vm140_vm2, %v1694_v11 }
  0x8e   :  { %1060 = vmatmul.msk.bf16.vlgmr.msra.gmra.mxu2 %vm140_vm2, %v1694_v11  ;;  %1061 = vmatmul.msk.bf16.vlgmr.msra.gmra.mxu3 %vm140_vm2, %v1694_v11 }
  0x8f   :  { %844 = vmatpush.bf16.msra.mxu0 %v1251_v12  ;;  %858 = vmatpush.bf16.msra.mxu1 %v1315_v13  ;;  %v1553_v12 = vld [vmem:[#allocation5 + $0x2e4] sm:$0xf0]  ;;  %v1211_v13 = vor.u32 %v1497_v4, %v1210_v1  ;;  %v1484_v1 = vld [vmem:[#allocation5 + $0xc4] sm:$0xf]  ;;  %v1338_v4 = vld [vmem:[#allocation5 + $0x220] sm:$0xf] }
  0x90   :  { %872 = vmatpush.bf16.msra.mxu2 %v1379_v60  ;;  %886 = vmatpush.bf16.msra.mxu3 %v1443_v8  ;;  %v1435_v21 = vor.u32 %v1553_v12, %v1434_v10  ;;  %v1411_v60 = vor.u32 %v1547_v53, %v1410_v52  ;;  %v1167_v6 = vor.u32 %v1484_v1, %v1164_v3  ;;  %v1402_v8 = vld [vmem:[#allocation5 + $0x2a0] sm:$0xf]  ;;  %v1466_v10 = vld [vmem:[#allocation5 + $0x34] sm:$0xf]  ;;  %v1316_v52 = vld [vmem:[#allocation5 + $0x1f8] sm:$0xf0] }
  0x91   :  { %v1339_v7 = vor.u32 %v1529_v5, %v1338_v4  ;;  %v1538_v1 = vld [vmem:[#allocation5 + $0x274] sm:$0xf] }
  0x92   :  { %v1554_v3 = vld [vmem:[#allocation5 + $0x2f4] sm:$0xf] }
  0x93   :  { %845 = vmatpush.bf16.msra.mxu0 %v1243_v24  ;;  %859 = vmatpush.bf16.msra.mxu1 %v1307_v25  ;;  %v1551_v24 = vld [vmem:[#allocation5 + $0x2d4] sm:$0xf0]  ;;  %v1203_v25 = vor.u32 %v1495_v18, %v1202_v15  ;;  %v1156_v15 = vld [vmem:[#allocation5 + $0xb8] sm:$0xf0]  ;;  %v1330_v18 = vld [vmem:[#allocation5 + $0x210] sm:$0xf] }
  0x94   :  { %873 = vmatpush.bf16.msra.mxu2 %v1371_v9  ;;  %887 = vmatpush.bf16.msra.mxu3 %v1435_v21  ;;  %v1545_v9 = vld [vmem:[#allocation5 + $0x2a4] sm:$0xf0]  ;;  %v1331_v21 = vor.u32 %v1527_v19, %v1330_v18  ;;  %v1372_v18 = vld [vmem:[#allocation5 + $0x268] sm:$0xf0] }
  0x95   :  { %v1403_v12 = vor.u32 %v1545_v9, %v1402_v8  ;;  %v1236_v8 = vld [vmem:[#allocation5 + $0x158] sm:$0xf0]  ;;  %v1518_v9 = vld [vmem:[#allocation5 + $0x1d4] sm:$0xf] }
  0x97   :  { %846 = vmatpush.bf16.msra.mxu0 %v1235_v36  ;;  %860 = vmatpush.bf16.msra.mxu1 %v1299_v37  ;;  %v1427_v36 = vor.u32 %v1551_v24, %v1426_v23  ;;  %v1355_v37 = vor.u32 %v1533_v29, %v1354_v28  ;;  %v1464_v23 = vld [vmem:[#allocation5 + $0x24] sm:$0xf]  ;;  %v1084_v24 = vld [vmem:[#allocation5 + $0x28] sm:$0xf0]  ;;  %v1322_v29 = vld [vmem:[#allocation5 + $0x200] sm:$0xf] }
  0x98   :  { %874 = vmatpush.bf16.msra.mxu2 %v1363_v22  ;;  %v1323_v32 = vor.u32 %v1525_v30, %v1322_v29 }
  0x99   :  { %888 = vmatpush.bf16.msra.mxu3 %v1427_v36  ;;  %v1076_v36 = vld [vmem:[#allocation5 + $0x18] sm:$0xf0] }
  0x9a   :  { %v1079_v39 = vor.u32 %v1462_v35, %v1076_v36  ;;  %v1550_v35 = vld [vmem:[#allocation5 + $0x2d4] sm:$0xf]  ;;  %v1428_v36 = vld [vmem:[#allocation5 + $0x2d8] sm:$0xf0] }
  0x9b   :  { %847 = vmatpush.bf16.msra.mxu0 %v1227_v48  ;;  %861 = vmatpush.bf16.msra.mxu1 %v1291_v49  ;;  %v1488_v48 = vld [vmem:[#allocation5 + $0xe4] sm:$0xf]  ;;  %v1180_v49 = vld [vmem:[#allocation5 + $0xe8] sm:$0xf0] }
  0x9c   :  { %875 = vmatpush.bf16.msra.mxu2 %v1355_v37  ;;  %v1183_v55 = vor.u32 %v1488_v48, %v1180_v49  ;;  %v1478_v37 = vld [vmem:[#allocation5 + $0x94] sm:$0xf] }
  0x9d   :  { %1062 = vmatmul.msk.bf16.vlgmr.msrb.gmra.mxu0 %vm140_vm2, %v1694_v11  ;;  %1063 = vmatmul.msk.bf16.vlgmr.msrb.gmra.mxu1 %vm140_vm2, %v1694_v11  ;;  %v1194_v11 = vld [vmem:[#allocation5 + $0x100] sm:$0xf]  ;;  %v1506_v49 = vld [vmem:[#allocation5 + $0x174] sm:$0xf] }
  0x9e   :  { %v1195_v40 = vor.u32 %v1493_v27, %v1194_v11  ;;  %889 = vmatpush.bf16.msra.mxu3 %v1419_v50  ;;  %v1543_v11 = vld [vmem:[#allocation5 + $0x294] sm:$0xf0]  ;;  %v1148_v27 = vld [vmem:[#allocation5 + $0xa8] sm:$0xf0]  ;;  %v1252_v50 = vld [vmem:[#allocation5 + $0x178] sm:$0xf0] }
  0x9f   :  { %848 = vmatpush.bf16.msra.mxu0 %v1219_v63  ;;  %862 = vmatpush.bf16.msra.mxu1 %v1283_v0  ;;  %v1468_v63 = vld [vmem:[#allocation5 + $0x44] sm:$0xf]  ;;  %v1100_v0 = vld [vmem:[#allocation5 + $0x48] sm:$0xf0]  ;;  %v1395_v22 = vor.u32 %v1543_v11, %v1394_v20  ;;  %v1255_v57 = vor.u32 %v1506_v49, %v1252_v50 }
  0xa0   :  { %876 = vmatpush.bf16.msra.mxu2 %v1347_v51  ;;  %v1103_v2 = vor.u32 %v1468_v63, %v1100_v0  ;;  %v1522_v51 = vld [vmem:[#allocation5 + $0x1f4] sm:$0xf]  ;;  %v1520_v63 = vld [vmem:[#allocation5 + $0x1e4] sm:$0xf]  ;;  %v1308_v0 = vld [vmem:[#allocation5 + $0x1e8] sm:$0xf0] }
  0xa1   :  { %v1319_v58 = vor.u32 %v1522_v51, %v1316_v52  ;;  %v1311_v5 = vor.u32 %v1520_v63, %v1308_v0  ;;  %v1546_v63 = vld [vmem:[#allocation5 + $0x2b4] sm:$0xf]  ;;  %v1412_v0 = vld [vmem:[#allocation5 + $0x2b8] sm:$0xf0] }
  0xa2   :  { %890 = vmatpush.bf16.msra.mxu3 %v1411_v60 }
  0xa3   :  { %849 = vmatpush.bf16.msra.mxu0 %v1211_v13  ;;  %863 = vmatpush.bf16.msra.mxu1 %v1275_v14  ;;  %v1092_v13 = vld [vmem:[#allocation5 + $0x38] sm:$0xf0]  ;;  %v1482_v14 = vld [vmem:[#allocation5 + $0xb4] sm:$0xf] }
  0xa4   :  { %877 = vmatpush.bf16.msra.mxu2 %v1339_v7  ;;  %v1095_v16 = vor.u32 %v1466_v10, %v1092_v13  ;;  %v1159_v17 = vor.u32 %v1482_v14, %v1156_v15  ;;  %v1502_v7 = vld [vmem:[#allocation5 + $0x154] sm:$0xf]  ;;  %v1300_v10 = vld [vmem:[#allocation5 + $0x1d8] sm:$0xf0] }
  0xa6   :  { %891 = vmatpush.bf16.msra.mxu3 %v1403_v12 }
  0xa7   :  { %850 = vmatpush.bf16.msra.mxu0 %v1203_v25  ;;  %864 = vmatpush.bf16.msra.mxu1 %v1267_v26  ;;  %v1480_v25 = vld [vmem:[#allocation5 + $0xa4] sm:$0xf]  ;;  %v1087_v26 = vor.u32 %v1464_v23, %v1084_v24  ;;  %v1436_v24 = vld [vmem:[#allocation5 + $0x2e8] sm:$0xf0] }
  0xa8   :  { %878 = vmatpush.bf16.msra.mxu2 %v1331_v21  ;;  %v1151_v28 = vor.u32 %v1480_v25, %v1148_v27  ;;  %v1552_v23 = vld [vmem:[#allocation5 + $0x2e4] sm:$0xf] }
  0xa9   :  { %v1500_v25 = vld [vmem:[#allocation5 + $0x144] sm:$0xf]  ;;  %v1439_v30 = vor.u32 %v1552_v23, %v1436_v24  ;;  %v1526_v23 = vld [vmem:[#allocation5 + $0x214] sm:$0xf]  ;;  %v1332_v24 = vld [vmem:[#allocation5 + $0x218] sm:$0xf0] }
  0xaa   :  { %892 = vmatpush.bf16.msra.mxu3 %v1395_v22  ;;  %v1303_v22 = vor.u32 %v1518_v9, %v1300_v10  ;;  %v1516_v27 = vld [vmem:[#allocation5 + $0x1c4] sm:$0xf]  ;;  %v1340_v10 = vld [vmem:[#allocation5 + $0x228] sm:$0xf0] }
  0xab   :  { %851 = vmatpush.bf16.msra.mxu0 %v1195_v40  ;;  %865 = vmatpush.bf16.msra.mxu1 %v1259_v41  ;;  %v1143_v40 = vor.u32 %v1478_v37, %v1140_v38  ;;  %v1460_v41 = vld [vmem:[#allocation5 + $0x4] sm:$0xf]  ;;  %v1498_v37 = vld [vmem:[#allocation5 + $0x134] sm:$0xf]  ;;  %v1220_v38 = vld [vmem:[#allocation5 + $0x138] sm:$0xf0] }
  0xac   :  { %879 = vmatpush.bf16.msra.mxu2 %v1323_v32  ;;  %v1071_v43 = vor.u32 %v1460_v41, %v1068_v42  ;;  %v1431_v42 = vor.u32 %v1550_v35, %v1428_v36  ;;  %v1223_v51 = vor.u32 %v1498_v37, %v1220_v38  ;;  %v1528_v9 = vld [vmem:[#allocation5 + $0x224] sm:$0xf]  ;;  %v330_v35 = vld [vmem:[%s1741_s3] sm:$0x3]  ;;  %s1654_s3 = smov [#allocation7]  }
  0xad   :  { %v332_v36 = vperm.slane %v330_v35, 0  ;;  %s992_s6 = sshll.u32 %s1654_s3, 4  ;;  %s993_s6 = int_to_ptr.vmem [resolvable:$true] %s992_s6 }
  0xae   :  { %893 = vmatpush.bf16.msra.mxu3 %v1387_v34  ;;  %v1364_v34 = vld [vmem:[#allocation5 + $0x258] sm:$0xf0] }
  0xaf   :  { %900 = vmatpush.bf16.msrb.mxu0 %v1127_v44  ;;  %914 = vmatpush.bf16.msrb.mxu1 %v1191_v45  ;;  %v1476_v44 = vld [vmem:[#allocation5 + $0x84] sm:$0xf]  ;;  %v1132_v45 = vld [vmem:[#allocation5 + $0x88] sm:$0xf0]  ;;  %v1367_v41 = vor.u32 %v1534_v31, %v1364_v34 }
  0xb0   :  { %v1135_v46 = vor.u32 %v1476_v44, %v1132_v45  ;;  %v1540_v31 = vld [vmem:[#allocation5 + $0x284] sm:$0xf] }
  0xb3   :  { %901 = vmatpush.bf16.msrb.mxu0 %v1119_v54  ;;  %915 = vmatpush.bf16.msrb.mxu1 %v1183_v55 }
  0xb7   :  { %902 = vmatpush.bf16.msrb.mxu0 %v1111_v61  ;;  %916 = vmatpush.bf16.msrb.mxu1 %v1175_v62  ;;  %v1244_v62 = vld [vmem:[#allocation5 + $0x168] sm:$0xf0] }
  0xb8   :  { %v1247_v4 = vor.u32 %v1504_v59, %v1244_v62  ;;  %v1530_v59 = vld [vmem:[#allocation5 + $0x234] sm:$0xf]  ;;  %v1348_v62 = vld [vmem:[#allocation5 + $0x238] sm:$0xf0] }
  0xbb   :  { %903 = vmatpush.bf16.msrb.mxu0 %v1103_v2  ;;  %917 = vmatpush.bf16.msrb.mxu1 %v1167_v6  ;;  %v1380_v2 = vld [vmem:[#allocation5 + $0x278] sm:$0xf0] }
  0xbc   :  { %v1444_v6 = vld [vmem:[#allocation5 + $0x2f8] sm:$0xf0]  ;;  %v1383_v14 = vor.u32 %v1538_v1, %v1380_v2 }
  0xbd   :  { %v1447_v15 = vor.u32 %v1554_v3, %v1444_v6  ;;  %v1494_v3 = vld [vmem:[#allocation5 + $0x114] sm:$0xf]  ;;  %v1268_v6 = vld [vmem:[#allocation5 + $0x198] sm:$0xf0] }
  0xbf   :  { %904 = vmatpush.bf16.msrb.mxu0 %v1095_v16  ;;  %918 = vmatpush.bf16.msrb.mxu1 %v1159_v17  ;;  %v1239_v16 = vor.u32 %v1502_v7, %v1236_v8  ;;  %v1536_v17 = vld [vmem:[#allocation5 + $0x264] sm:$0xf]  ;;  %v1351_v7 = vor.u32 %v1530_v59, %v1348_v62  ;;  %v1415_v8 = vor.u32 %v1546_v63, %v1412_v0 }
  0xc0   :  { %v1375_v29 = vor.u32 %v1536_v17, %v1372_v18  ;;  %v1196_v17 = vld [vmem:[#allocation5 + $0x108] sm:$0xf0]  ;;  %v1508_v18 = vld [vmem:[#allocation5 + $0x184] sm:$0xf] }
  0xc3   :  { %905 = vmatpush.bf16.msrb.mxu0 %v1087_v26  ;;  %919 = vmatpush.bf16.msrb.mxu1 %v1151_v28  ;;  %v1228_v26 = vld [vmem:[#allocation5 + $0x148] sm:$0xf0] }
  0xc4   :  { %v1292_v28 = vld [vmem:[#allocation5 + $0x1c8] sm:$0xf0]  ;;  %v1231_v32 = vor.u32 %v1500_v25, %v1228_v26  ;;  %v1542_v25 = vld [vmem:[#allocation5 + $0x294] sm:$0xf]  ;;  %v1396_v26 = vld [vmem:[#allocation5 + $0x298] sm:$0xf0] }
  0xc5   :  { %v1295_v33 = vor.u32 %v1516_v27, %v1292_v28 }
  0xc7   :  { %906 = vmatpush.bf16.msrb.mxu0 %v1079_v39  ;;  %920 = vmatpush.bf16.msrb.mxu1 %v1143_v40  ;;  %v1514_v39 = vld [vmem:[#allocation5 + $0x1b4] sm:$0xf]  ;;  %v1284_v40 = vld [vmem:[#allocation5 + $0x1b8] sm:$0xf0] }
  0xc8   :  { %v1287_v52 = vor.u32 %v1514_v39, %v1284_v40 }
  0xcb   :  { %907 = vmatpush.bf16.msrb.mxu0 %v1071_v43  ;;  %921 = vmatpush.bf16.msrb.mxu1 %v1135_v46  ;;  %v1532_v43 = vld [vmem:[#allocation5 + $0x244] sm:$0xf]  ;;  %v1356_v46 = vld [vmem:[#allocation5 + $0x248] sm:$0xf0] }
 0x10a   :  { %v153_v47 = vpop.f32.mrf.mxu0  ;;  %v167_v48 = vpop.f32.mrf.mxu1 }
 0x111   :  { %v181_v53 = vpop.f32.mrf.mxu2  ;;  %v195_v54 = vpop.f32.mrf.mxu3 }
 0x112   :  { %v155_v55 = vpop.f32.mrf.mxu0  ;;  %v169_v56 = vpop.f32.mrf.mxu1 }
 0x113   :  { %v1708_v60 = vpack.c.bf16 %v155_v55, %v153_v47  ;;  %v1710_v61 = vpack.c.bf16 %v169_v56, %v167_v48  ;;  %v1548_v47 = vld [vmem:[#allocation5 + $0x2c4] sm:$0xf]  ;;  %v1420_v48 = vld [vmem:[#allocation5 + $0x2c8] sm:$0xf0] }
 0x114   :  { %v1512_v55 = vld [vmem:[#allocation5 + $0x1a4] sm:$0xf]  ;;  %v1276_v56 = vld [vmem:[#allocation5 + $0x1a8] sm:$0xf0] }
 0x115   :  { %824 = vmatmul.bf16.vlgmr.msrb.gmra.mxu2 %v1708_v60  ;;  %838 = vmatmul.bf16.vlgmr.msrb.gmra.mxu3 %v1710_v61  ;;  %v1279_v2 = vor.u32 %v1512_v55, %v1276_v56 }
 0x116   :  { %928 = vmatpush.bf16.msrb.mxu2 %v1255_v57  ;;  %942 = vmatpush.bf16.msrb.mxu3 %v1319_v58  ;;  %v1359_v57 = vor.u32 %v1532_v43, %v1356_v46  ;;  %v1423_v58 = vor.u32 %v1548_v47, %v1420_v48 }
 0x119   :  { %v183_v12 = vpop.f32.mrf.mxu2  ;;  %v197_v13 = vpop.f32.mrf.mxu3 }
 0x11a   :  { %v1714_v19 = vpack.c.bf16 %v183_v12, %v181_v53  ;;  %v1716_v20 = vpack.c.bf16 %v197_v13, %v195_v54  ;;  %v209_v21 = vpop.f32.mrf.mxu0  ;;  %v223_v11 = vpop.f32.mrf.mxu1  ;;  %929 = vmatpush.bf16.msrb.mxu2 %v1247_v4  ;;  %943 = vmatpush.bf16.msrb.mxu3 %v1311_v5  ;;  %v1496_v53 = vld [vmem:[#allocation5 + $0x124] sm:$0xf]  ;;  %v1212_v54 = vld [vmem:[#allocation5 + $0x128] sm:$0xf0]  ;;  %v1204_v4 = vld [vmem:[#allocation5 + $0x118] sm:$0xf0] }
 0x11b   :  { %v1215_v1 = vor.u32 %v1496_v53, %v1212_v54  ;;  %v1510_v5 = vld [vmem:[#allocation5 + $0x194] sm:$0xf]  ;;  %v1544_v12 = vld [vmem:[#allocation5 + $0x2a4] sm:$0xf]  ;;  %v1404_v13 = vld [vmem:[#allocation5 + $0x2a8] sm:$0xf0] }
 0x11c   :  { %852 = vmatmul.bf16.vlgmr.msra.gmra.mxu0 %v1714_v19  ;;  %866 = vmatmul.bf16.vlgmr.msra.gmra.mxu1 %v1716_v20 }
 0x11d   :  { %956 = vmatpush.bf16.msra.mxu0 %v1383_v14  ;;  %970 = vmatpush.bf16.msra.mxu1 %v1447_v15  ;;  %v1207_v14 = vor.u32 %v1494_v3, %v1204_v4  ;;  %v1271_v15 = vor.u32 %v1510_v5, %v1268_v6 }
 0x11e   :  { %930 = vmatpush.bf16.msrb.mxu2 %v1239_v16  ;;  %944 = vmatpush.bf16.msrb.mxu3 %v1303_v22  ;;  %v1492_v16 = vld [vmem:[#allocation5 + $0x104] sm:$0xf]  ;;  %v1407_v22 = vor.u32 %v1544_v12, %v1404_v13 }
 0x11f   :  { %v1199_v27 = vor.u32 %v1492_v16, %v1196_v17 }
 0x121   :  { %957 = vmatpush.bf16.msra.mxu0 %v1375_v29  ;;  %971 = vmatpush.bf16.msra.mxu1 %v1439_v30  ;;  %v1399_v29 = vor.u32 %v1542_v25, %v1396_v26  ;;  %v1324_v30 = vld [vmem:[#allocation5 + $0x208] sm:$0xf0] }
 0x122   :  { %v211_v44 = vpop.f32.mrf.mxu0  ;;  %v225_v45 = vpop.f32.mrf.mxu1  ;;  %931 = vmatpush.bf16.msrb.mxu2 %v1231_v32  ;;  %945 = vmatpush.bf16.msrb.mxu3 %v1295_v33  ;;  %v1388_v32 = vld [vmem:[#allocation5 + $0x288] sm:$0xf0] }
 0x123   :  { %v1720_v49 = vpack.c.bf16 %v211_v44, %v209_v21  ;;  %v1722_v50 = vpack.c.bf16 %v225_v45, %v223_v11  ;;  %v1260_v21 = vld [vmem:[#allocation5 + $0x188] sm:$0xf0]  ;;  %v1343_v11 = vor.u32 %v1528_v9, %v1340_v10  ;;  %v1391_v34 = vor.u32 %v1540_v31, %v1388_v32 }
 0x124   :  { %v1263_v28 = vor.u32 %v1508_v18, %v1260_v21 }
 0x125   :  { %958 = vmatpush.bf16.msra.mxu0 %v1367_v41  ;;  %972 = vmatpush.bf16.msra.mxu1 %v1431_v42 }
 0x126   :  { %880 = vmatmul.bf16.vlgmr.msra.gmra.mxu2 %v1720_v49  ;;  %894 = vmatmul.bf16.vlgmr.msra.gmra.mxu3 %v1722_v50 }
 0x127   :  { %932 = vmatpush.bf16.msrb.mxu2 %v1223_v51  ;;  %946 = vmatpush.bf16.msrb.mxu3 %v1287_v52 }
 0x129   :  { %959 = vmatpush.bf16.msra.mxu0 %v1359_v57  ;;  %973 = vmatpush.bf16.msra.mxu1 %v1423_v58  ;;  %v333_v57 = vperm.slane %v330_v35, 1 }
 0x12b   :  { %933 = vmatpush.bf16.msrb.mxu2 %v1215_v1  ;;  %947 = vmatpush.bf16.msrb.mxu3 %v1279_v2 }
 0x12c   :  { %908 = vmatmul.bf16.vlgmr.msrb.gmra.mxu0 %v1708_v60  ;;  %922 = vmatmul.bf16.vlgmr.msrb.gmra.mxu1 %v1710_v61  ;;  %v1335_v60 = vor.u32 %v1526_v23, %v1332_v24  ;;  %v1524_v61 = vld [vmem:[#allocation5 + $0x204] sm:$0xf] }
 0x12d   :  { %960 = vmatpush.bf16.msra.mxu0 %v1351_v7  ;;  %974 = vmatpush.bf16.msra.mxu1 %v1415_v8  ;;  %v1327_v33 = vor.u32 %v1524_v61, %v1324_v30 }
 0x12f   :  { %934 = vmatpush.bf16.msrb.mxu2 %v1207_v14  ;;  %948 = vmatpush.bf16.msrb.mxu3 %v1271_v15 }
 0x131   :  { %961 = vmatpush.bf16.msra.mxu0 %v1343_v11  ;;  %975 = vmatpush.bf16.msra.mxu1 %v1407_v22 }
 0x133   :  { %935 = vmatpush.bf16.msrb.mxu2 %v1199_v27  ;;  %949 = vmatpush.bf16.msrb.mxu3 %v1263_v28 }
 0x135   :  { %962 = vmatpush.bf16.msra.mxu0 %v1335_v60  ;;  %976 = vmatpush.bf16.msra.mxu1 %v1399_v29 }
 0x136   :  { %936 = vmatmul.bf16.vlgmr.msrb.gmra.mxu2 %v1714_v19  ;;  %950 = vmatmul.bf16.vlgmr.msrb.gmra.mxu3 %v1716_v20 }
 0x139   :  { %963 = vmatpush.bf16.msra.mxu0 %v1327_v33  ;;  %977 = vmatpush.bf16.msra.mxu1 %v1391_v34 }
 0x13c   :  { %964 = vmatmul.bf16.vlgmr.msra.gmra.mxu0 %v1720_v49  ;;  %978 = vmatmul.bf16.vlgmr.msra.gmra.mxu1 %v1722_v50 }
 0x198   :  { %v825_v37 = vpop.f32.mrf.mxu2  ;;  %v839_v38 = vpop.f32.mrf.mxu3 }
 0x199   :  { %v853_v39 = vpop.f32.mrf.mxu0  ;;  %v867_v40 = vpop.f32.mrf.mxu1  ;;  %v826_v41 = vadd.f32 %v825_v37, %v332_v36 }
 0x19b   :  { %v840_v42 = vadd.f32 %v839_v38, %v826_v41 }
 0x19d   :  { %v854_v45 = vadd.f32 %v853_v39, %v840_v42 }
 0x19f   :  { %v868_v47 = vadd.f32 %v867_v40, %v854_v45 }
 0x1a0   :  { %v827_v19 = vpop.f32.mrf.mxu2  ;;  %v841_v43 = vpop.f32.mrf.mxu3 }
 0x1a1   :  { %v855_v20 = vpop.f32.mrf.mxu0  ;;  %v869_v44 = vpop.f32.mrf.mxu1  ;;  %v828_v46 = vadd.f32 %v827_v19, %v332_v36 }
 0x1a3   :  { %v842_v48 = vadd.f32 %v841_v43, %v828_v46 }
 0x1a5   :  { %v856_v54 = vadd.f32 %v855_v20, %v842_v48 }
 0x1a7   :  { %v870_v56 = vadd.f32 %v869_v44, %v856_v54 }
 0x1a9   :  { %v881_v49 = vpop.f32.mrf.mxu2  ;;  %v895_v50 = vpop.f32.mrf.mxu3 }
 0x1aa   :  { %v882_v51 = vadd.f32 %v881_v49, %v868_v47  ;;  %v909_v52 = vpop.f32.mrf.mxu0  ;;  %v923_v53 = vpop.f32.mrf.mxu1 }
 0x1ab   :  { %v910_v1 = vadd.f32 %v909_v52, %v333_v57 }
 0x1ac   :  { %v896_v55 = vadd.f32 %v895_v50, %v882_v51 }
 0x1ad   :  { %v924_v3 = vadd.f32 %v923_v53, %v910_v1 }
 0x1ae   :  { %984 = vst [vmem:[#allocation7] sm:$0xff] %v896_v55 }
 0x1b1   :  { %v883_v58 = vpop.f32.mrf.mxu2  ;;  %v897_v59 = vpop.f32.mrf.mxu3 }
 0x1b2   :  { %v884_v62 = vadd.f32 %v883_v58, %v870_v56  ;;  %v911_v63 = vpop.f32.mrf.mxu0  ;;  %v925_v0 = vpop.f32.mrf.mxu1 }
 0x1b3   :  { %v912_v8 = vadd.f32 %v911_v63, %v333_v57 }
 0x1b4   :  { %v898_v2 = vadd.f32 %v897_v59, %v884_v62 }
 0x1b5   :  { %v926_v13 = vadd.f32 %v925_v0, %v912_v8 }
 0x1b6   :  { %986 = vst [vmem:[#allocation7 + $0x10] sm:$0xff] %v898_v2 }
 0x1b9   :  { %v937_v4 = vpop.f32.mrf.mxu2  ;;  %v951_v5 = vpop.f32.mrf.mxu3 }
 0x1ba   :  { %v938_v6 = vadd.f32 %v937_v4, %v924_v3  ;;  %v965_v7 = vpop.f32.mrf.mxu0  ;;  %v979_v10 = vpop.f32.mrf.mxu1 }
 0x1bc   :  { %v952_v9 = vadd.f32 %v951_v5, %v938_v6 }
 0x1be   :  { %v966_v12 = vadd.f32 %v965_v7, %v952_v9 }
 0x1c0   :  { %v980_v14 = vadd.f32 %v979_v10, %v966_v12 }
 0x1c1   :  { %v939_v15 = vpop.f32.mrf.mxu2  ;;  %v953_v17 = vpop.f32.mrf.mxu3 }
 0x1c2   :  { %985 = vst [vmem:[#allocation7 + $0x8] sm:$0xff] %v980_v14  ;;  %v940_v16 = vadd.f32 %v939_v15, %v926_v13  ;;  %v967_v21 = vpop.f32.mrf.mxu0  ;;  %v981_v22 = vpop.f32.mrf.mxu1 }
 0x1c4   :  { %v954_v18 = vadd.f32 %v953_v17, %v940_v16 }
 0x1c6   :  { %v968_v11 = vadd.f32 %v967_v21, %v954_v18 }
 0x1c8   :  { %v982_v23 = vadd.f32 %v981_v22, %v968_v11 }
 0x1ca   :  { %987 = vst [vmem:[#allocation7 + $0x18] sm:$0xff] %v982_v23 }
 0x1cb   :  { %1000 = dma.vmem_to_hbm [thread:$0]  %s993_s6, 512, %s995_s9, [#allocation4], %s1655_s10, %s1655_s10, %s1656_s11  }
 0x1cc   :  { %1644 = dma.done.wait [#allocation4], 512  }
 0x1cd   :  { %1645 = vsyncadd [#allocation4], 4294966784 }
 0x1ce   :  { %1005 = vsyncpa [#allocation3], 1 }
 0x1cf   :  { %1006 = vsyncpa [#allocation6], 1 }
 0x1d0   :  { %1007 = vsyncpa [#allocation4], 1 }

</bundles_post_ra>
